<compile_context>
chip_gen: v7x
topology: tpu7x:2x2x1
jax: 0.10.0
libtpu: 0.0.40
codegen_flags: <defaults>
</compile_context>

<pallas_src>
import jax
import jax.numpy as jnp
from jax.experimental import pallas as pl
from jax.experimental.pallas import tpu as pltpu

_LANES = 128
_MAX_TILE_ROWS = 2048      # 1 MiB per input per pipeline buffer (f32)
_CORE_SPLITS = 2           # leading "parallel" axis: 2 TCs on v7x, harmless elsewhere
_SMALL_N = 1 << 17         # below this a fused XLA reduction beats kernel launch cost


def _value_loss_kernel(info_ref, off_ref, pred_ref, targ_ref,
                       sum_ref, min_ref, max_ref):
    """Per-tile partial reductions into lane-dense resident accumulators.

    info_ref : SMEM (2,) int32  -> [nrows_full, rem]
               rows [0, nrows_full) are fully valid; row nrows_full has `rem`
               valid lanes (rem == 0 -> no partial row).
    off_ref  : SMEM (2,) f32    -> shift offsets (pred[0], targ[0])
    pred_ref, targ_ref : VMEM (tile_rows, 128) tiles
    sum_ref  : VMEM (1, 768) per-lane sums of
               [(p-t)^2, p-op, t-ot, (p-op)(t-ot), (p-op)^2, (t-ot)^2]
    min_ref  : VMEM (1, 256) per-lane [min(p), min(t)]
    max_ref  : VMEM (1, 256) per-lane [max(p), max(t)]
    """
    c = pl.program_id(0)          # core-split index ("parallel")
    i = pl.program_id(1)          # per-core step   ("arbitrary")
    steps = pl.num_programs(1)
    tile_rows, lanes = pred_ref.shape

    @pl.when(i == 0)
    def _init():
        sum_ref[...] = jnp.zeros_like(sum_ref)
        min_ref[...] = jnp.full(min_ref.shape, jnp.inf, dtype=min_ref.dtype)
        max_ref[...] = jnp.full(max_ref.shape, -jnp.inf, dtype=max_ref.dtype)

    nrows_full = info_ref[0]
    rem = info_ref[1]
    off_p = off_ref[0]
    off_t = off_ref[1]

    tile_idx = c * steps + i                    # logical (unclamped) tile index
    row0 = tile_idx * tile_rows                 # first global row of this tile
    fully_valid = (row0 + tile_rows) <= nrows_full

    def _accum(d, ps, ts, p_min, p_max, t_min, t_max):
        # Each reduce lands in its own 128-lane-aligned accumulator slice:
        # one vreg read-modify-write per quantity, no concatenations.
        sum_ref[:, 0 * lanes:1 * lanes] += jnp.sum(d * d, axis=0, keepdims=True)
        sum_ref[:, 1 * lanes:2 * lanes] += jnp.sum(ps, axis=0, keepdims=True)
        sum_ref[:, 2 * lanes:3 * lanes] += jnp.sum(ts, axis=0, keepdims=True)
        sum_ref[:, 3 * lanes:4 * lanes] += jnp.sum(ps * ts, axis=0, keepdims=True)
        sum_ref[:, 4 * lanes:5 * lanes] += jnp.sum(ps * ps, axis=0, keepdims=True)
        sum_ref[:, 5 * lanes:6 * lanes] += jnp.sum(ts * ts, axis=0, keepdims=True)
        min_ref[:, 0:lanes] = jnp.minimum(
            min_ref[:, 0:lanes], jnp.min(p_min, axis=0, keepdims=True))
        min_ref[:, lanes:2 * lanes] = jnp.minimum(
            min_ref[:, lanes:2 * lanes], jnp.min(t_min, axis=0, keepdims=True))
        max_ref[:, 0:lanes] = jnp.maximum(
            max_ref[:, 0:lanes], jnp.max(p_max, axis=0, keepdims=True))
        max_ref[:, lanes:2 * lanes] = jnp.maximum(
            max_ref[:, lanes:2 * lanes], jnp.max(t_max, axis=0, keepdims=True))

    @pl.when(fully_valid)
    def _full_tile():
        # Unmasked fast path: every element of this tile is valid data.
        p = pred_ref[...].astype(jnp.float32)
        t = targ_ref[...].astype(jnp.float32)
        _accum(p - t, p - off_p, t - off_t, p, p, t, t)

    @pl.when(jnp.logical_not(fully_valid))
    def _ragged_tile():
        # Boundary / out-of-range tile: mask Pallas block padding and the
        # partial last row.  Row/col based mask avoids 32-bit flat-index
        # overflow for huge inputs.
        p = pred_ref[...].astype(jnp.float32)
        t = targ_ref[...].astype(jnp.float32)
        row = row0 + jax.lax.broadcasted_iota(jnp.int32, (tile_rows, lanes), 0)
        col = jax.lax.broadcasted_iota(jnp.int32, (tile_rows, lanes), 1)
        valid = (row < nrows_full) | ((row == nrows_full) & (col < rem))
        inf = jnp.float32(jnp.inf)
        zero = jnp.float32(0.0)
        _accum(jnp.where(valid, p - t, zero),          # mask diff too (padding
               jnp.where(valid, p - off_p, zero),      # may be garbage here)
               jnp.where(valid, t - off_t, zero),
               jnp.where(valid, p, inf),
               jnp.where(valid, p, -inf),
               jnp.where(valid, t, inf),
               jnp.where(valid, t, -inf))


def _partials_pallas(p_flat, t_flat, offsets, n):
    """Returns (sums (6,), mins (2,), maxs (2,)) via the Pallas kernel."""
    nrows_full = n // _LANES
    rem = n % _LANES

    if rem == 0:
        # Free bitcast reshape: zero extra HBM traffic.
        p2d = p_flat.reshape(nrows_full, _LANES)
        t2d = t_flat.reshape(nrows_full, _LANES)
    else:
        # TODO(synk): lane-misaligned sizes still pay one pad copy; a manual
        # double-buffered DMA path (memory_space=pl.ANY) would remove it.
        pad = _LANES - rem
        p2d = jnp.pad(p_flat, (0, pad)).reshape(nrows_full + 1, _LANES)
        t2d = jnp.pad(t_flat, (0, pad)).reshape(nrows_full + 1, _LANES)
    rows = p2d.shape[0]

    if rows <= _MAX_TILE_ROWS:
        tile_rows = rows            # block == array (always legal), 1 tile
        num_tiles = 1
    else:
        tile_rows = _MAX_TILE_ROWS
        num_tiles = pl.cdiv(rows, tile_rows)

    core_splits = min(_CORE_SPLITS, num_tiles)
    steps = pl.cdiv(num_tiles, core_splits)
    last_tile = num_tiles - 1

    info = jnp.array([nrows_full, rem], dtype=jnp.int32)

    def data_map(c, i):
        # Clamp so duplicated / overhanging logical tiles re-read the last
        # real block; the in-kernel mask zeroes their contribution.
        return (jnp.minimum(c * steps + i, last_tile), 0)

    out_shapes = (
        jax.ShapeDtypeStruct((core_splits, 6 * _LANES), jnp.float32),
        jax.ShapeDtypeStruct((core_splits, 2 * _LANES), jnp.float32),
        jax.ShapeDtypeStruct((core_splits, 2 * _LANES), jnp.float32),
    )
    out_sum, out_min, out_max = pl.pallas_call(
        _value_loss_kernel,
        out_shape=out_shapes,
        grid=(core_splits, steps),
        in_specs=[
            pl.BlockSpec(memory_space=pltpu.SMEM),                 # info
            pl.BlockSpec(memory_space=pltpu.SMEM),                 # offsets
            pl.BlockSpec((tile_rows, _LANES), data_map),           # pred rows
            pl.BlockSpec((tile_rows, _LANES), data_map),           # targ rows
        ],
        out_specs=(
            pl.BlockSpec((1, 6 * _LANES), lambda c, i: (c, 0)),
            pl.BlockSpec((1, 2 * _LANES), lambda c, i: (c, 0)),
            pl.BlockSpec((1, 2 * _LANES), lambda c, i: (c, 0)),
        ),
        compiler_params=pltpu.CompilerParams(
            dimension_semantics=("parallel", "arbitrary"),
            vmem_limit_bytes=32 * 1024 * 1024),
    )(info, offsets, p2d, t2d)

    sums = out_sum.reshape(core_splits, 6, _LANES).sum(axis=(0, 2))
    mins = out_min.reshape(core_splits, 2, _LANES).min(axis=(0, 2))
    maxs = out_max.reshape(core_splits, 2, _LANES).max(axis=(0, 2))
    return sums, mins, maxs


def _partials_jax(p_flat, t_flat, offsets):
    """Small-N fast path: identical partials computed with fused XLA ops."""
    p = p_flat.astype(jnp.float32)
    t = t_flat.astype(jnp.float32)
    ps = p - offsets[0]
    ts = t - offsets[1]
    d = p - t
    sums = jnp.stack([jnp.sum(d * d), jnp.sum(ps), jnp.sum(ts),
                      jnp.sum(ps * ts), jnp.sum(ps * ps), jnp.sum(ts * ts)])
    mins = jnp.stack([jnp.min(p), jnp.min(t)])
    maxs = jnp.stack([jnp.max(p), jnp.max(t)])
    return sums, mins, maxs


def _finish(sums, mins, maxs, offsets, n, batch):
    n_f = jnp.float32(n)
    sq_sum, s_ps, s_ts, s_psts, s_psps, s_tsts = (sums[k] for k in range(6))
    off_p, off_t = offsets[0], offsets[1]

    loss = sq_sum / n_f
    m_ps = s_ps / n_f                 # mean of shifted pred
    m_ts = s_ts / n_f                 # mean of shifted targ
    mean_pred = m_ps + off_p
    mean_targ = m_ts + off_t

    if batch > 1:
        # Pearson correlation of squeeze(pred) vs squeeze(targ); constant
        # inputs yield nan/inf just like np.corrcoef.
        cov = s_psts / n_f - m_ps * m_ts
        var_p = s_psps / n_f - m_ps * m_ps
        var_t = s_tsts / n_f - m_ts * m_ts
        corr = cov / jnp.sqrt(var_p * var_t)
    else:
        corr = jnp.float32(jnp.nan)

    info = {
        'mean_pred': mean_pred,
        'mean_targ': mean_targ,
        'min_pred': mins[0],
        'min_targ': mins[1],
        'max_pred': maxs[0],
        'max_targ': maxs[1],
        'corr': corr,
    }
    return loss, info


def value_loss(pred, targ, *, min_kernel_elems=_SMALL_N):
    """JAX/Pallas equivalent of ValueLoss.forward with an L2 `_loss`.

    pred, targ: [batch, trajectory_dim]   (trajectory_dim == 1 in diffuser)
    Returns (loss, info_dict).
    """
    assert pred.shape == targ.shape
    batch = pred.shape[0]
    n = int(pred.size)

    p_flat = pred.reshape(-1)
    t_flat = targ.reshape(-1)
    # Shift offsets keep the correlation second-moments well conditioned.
    offsets = jnp.stack([p_flat[0], t_flat[0]]).astype(jnp.float32)

    if n >= max(min_kernel_elems, 1):
        sums, mins, maxs = _partials_pallas(p_flat, t_flat, offsets, n)
    else:
        sums, mins, maxs = _partials_jax(p_flat, t_flat, offsets)
    return _finish(sums, mins, maxs, offsets, n, batch)


if __name__ == "__main__":
    key = jax.random.PRNGKey(0)
    kp, kt = jax.random.split(key)

    def _reference(pred, targ):
        p = pred.astype(jnp.float32)
        t = targ.astype(jnp.float32)
        ref = {
            'loss': jnp.mean((p - t) ** 2),
            'mean_pred': p.mean(), 'mean_targ': t.mean(),
            'min_pred': p.min(), 'min_targ': t.min(),
            'max_pred': p.max(), 'max_targ': t.max(),
        }
        if pred.shape[0] > 1:
            ref['corr'] = jnp.corrcoef(
                jnp.stack([p.reshape(-1), t.reshape(-1)]))[0, 1]
        else:
            ref['corr'] = jnp.float32(jnp.nan)
        return ref

    def _check(pred, targ, loss, info, rtol, atol):
        ref = _reference(pred, targ)
        assert jnp.allclose(loss, ref['loss'], rtol=rtol, atol=atol)
        for k in ('mean_pred', 'mean_targ', 'min_pred', 'min_targ',
                  'max_pred', 'max_targ', 'corr'):
            assert jnp.allclose(info[k], ref[k], rtol=rtol, atol=atol), k

    # --- small case, matching the module's intended shapes (fast JAX path) ---
    pred_s = jax.random.normal(kp, (8, 1), dtype=jnp.float32)
    targ_s = jax.random.normal(kt, (8, 1), dtype=jnp.float32)
    loss_s, info_s = value_loss(pred_s, targ_s)
    jax.block_until_ready((loss_s, info_s))
    _check(pred_s, targ_s, loss_s, info_s, 1e-4, 1e-5)

    # --- same small case, forced through the Pallas kernel
    #     (exercises pad fallback + masked ragged tile) ---
    loss_sk, info_sk = value_loss(pred_s, targ_s, min_kernel_elems=0)
    jax.block_until_ready((loss_sk, info_sk))
    _check(pred_s, targ_s, loss_sk, info_sk, 1e-4, 1e-5)

    # --- large 128-aligned case: zero-copy reshape, multi-tile grid,
    #     unmasked fast branch, 2-way core split ---
    nbig = 1 << 20
    pred_b = jax.random.normal(kp, (nbig, 1), dtype=jnp.float32) + 3.0
    targ_b = 0.5 * pred_b + 0.1 * jax.random.normal(kt, (nbig, 1),
                                                    dtype=jnp.float32)
    loss_b, info_b = value_loss(pred_b, targ_b)
    jax.block_until_ready((loss_b, info_b))
    _check(pred_b, targ_b, loss_b, info_b, 1e-3, 1e-4)

    # --- large lane-misaligned case: pad fallback, ragged last tile,
    #     clamped duplicate tile on the second core split ---
    nrag = (1 << 19) + 77
    pred_r = 2.0 * jax.random.normal(kp, (nrag, 1), dtype=jnp.float32) - 1.0
    targ_r = -0.3 * pred_r + jax.random.normal(kt, (nrag, 1),
                                               dtype=jnp.float32)
    loss_r, info_r = value_loss(pred_r, targ_r)
    jax.block_until_ready((loss_r, info_r))
    _check(pred_r, targ_r, loss_r, info_r, 1e-3, 1e-4)

    print("KERNEL_OK")
</pallas_src>

<mosaic_0001>
module attributes {stable_mosaic.version = 11 : i64} {
  func.func @_value_loss_kernel(%arg0: i32, %arg1: i32, %arg2: memref<2xi32, #tpu.memory_space<smem>>, %arg3: memref<2xf32, #tpu.memory_space<smem>>, %arg4: memref<1x128xf32, #tpu.memory_space<vmem>>, %arg5: memref<1x128xf32, #tpu.memory_space<vmem>>, %arg6: memref<1x768xf32, #tpu.memory_space<vmem>>, %arg7: memref<1x256xf32, #tpu.memory_space<vmem>>, %arg8: memref<1x256xf32, #tpu.memory_space<vmem>>) attributes {dimension_semantics = [#tpu.dimension_semantics<parallel>, #tpu.dimension_semantics<arbitrary>], iteration_bounds = array<i64: 1, 1>, scalar_prefetch = 0 : i64, scratch_operands = 0 : i64, tpu.core_type = #tpu.core_type<tc>, window_params = [{transform_indices = @transform_0, window_bounds = array<i64: 2>}, {transform_indices = @transform_1, window_bounds = array<i64: 2>}, {transform_indices = @transform_2, window_bounds = array<i64: 1, 128>}, {transform_indices = @transform_3, window_bounds = array<i64: 1, 128>}, {transform_indices = @transform_4, window_bounds = array<i64: 1, 768>}, {transform_indices = @transform_5, window_bounds = array<i64: 1, 256>}, {transform_indices = @transform_6, window_bounds = array<i64: 1, 256>}]} {
    %c0_i32 = arith.constant 0 : i32
    %0 = arith.cmpi eq, %arg1, %c0_i32 : i32
    %1 = arith.extui %0 : i1 to i32
    %c0_i32_0 = arith.constant 0 : i32
    %2 = arith.cmpi ne, %1, %c0_i32_0 : i32
    scf.if %2 {
      %cst = arith.constant 0.000000e+00 : f32
      %17 = vector.broadcast %cst : f32 to vector<1x768xf32>
      %c0_7 = arith.constant 0 : index
      %c0_8 = arith.constant 0 : index
      %18 = vector.load %arg6[%c0_7, %c0_8] : memref<1x768xf32, #tpu.memory_space<vmem>>, vector<1x768xf32>
      tpu.vector_store %arg6[%c0_7, %c0_8], %17 {strides = array<i32>} : memref<1x768xf32, #tpu.memory_space<vmem>>, vector<1x768xf32>,
      %cst_9 = arith.constant 0x7F800000 : f32
      %19 = vector.broadcast %cst_9 : f32 to vector<1x256xf32>
      %c0_10 = arith.constant 0 : index
      %c0_11 = arith.constant 0 : index
      %20 = vector.load %arg7[%c0_10, %c0_11] : memref<1x256xf32, #tpu.memory_space<vmem>>, vector<1x256xf32>
      tpu.vector_store %arg7[%c0_10, %c0_11], %19 {strides = array<i32>} : memref<1x256xf32, #tpu.memory_space<vmem>>, vector<1x256xf32>,
      %cst_12 = arith.constant 0xFF800000 : f32
      %21 = vector.broadcast %cst_12 : f32 to vector<1x256xf32>
      %c0_13 = arith.constant 0 : index
      %c0_14 = arith.constant 0 : index
      %22 = vector.load %arg8[%c0_13, %c0_14] : memref<1x256xf32, #tpu.memory_space<vmem>>, vector<1x256xf32>
      tpu.vector_store %arg8[%c0_13, %c0_14], %21 {strides = array<i32>} : memref<1x256xf32, #tpu.memory_space<vmem>>, vector<1x256xf32>,
    } else {
    }
    %c0 = arith.constant 0 : index
    %3 = memref.load %arg2[%c0] : memref<2xi32, #tpu.memory_space<smem>>
    %c1 = arith.constant 1 : index
    %4 = memref.load %arg2[%c1] : memref<2xi32, #tpu.memory_space<smem>>
    %c0_1 = arith.constant 0 : index
    %5 = memref.load %arg3[%c0_1] : memref<2xf32, #tpu.memory_space<smem>>
    %c1_2 = arith.constant 1 : index
    %6 = memref.load %arg3[%c1_2] : memref<2xf32, #tpu.memory_space<smem>>
    %c1_i32 = arith.constant 1 : i32
    %7 = arith.muli %arg0, %c1_i32 : i32
    %8 = arith.addi %7, %arg1 : i32
    %c1_i32_3 = arith.constant 1 : i32
    %9 = arith.muli %8, %c1_i32_3 : i32
    %c1_i32_4 = arith.constant 1 : i32
    %10 = arith.addi %9, %c1_i32_4 : i32
    %11 = arith.cmpi sle, %10, %3 : i32
    %12 = arith.extui %11 : i1 to i32
    %c0_i32_5 = arith.constant 0 : i32
    %13 = arith.cmpi ne, %12, %c0_i32_5 : i32
    scf.if %13 {
      %c0_7 = arith.constant 0 : index
      %c0_8 = arith.constant 0 : index
      %17 = vector.load %arg4[%c0_7, %c0_8] : memref<1x128xf32, #tpu.memory_space<vmem>>, vector<1x128xf32>
      %c0_9 = arith.constant 0 : index
      %c0_10 = arith.constant 0 : index
      %18 = vector.load %arg5[%c0_9, %c0_10] : memref<1x128xf32, #tpu.memory_space<vmem>>, vector<1x128xf32>
      %19 = arith.subf %17, %18 : vector<1x128xf32>
      %20 = vector.broadcast %5 : f32 to vector<1x128xf32>
      %21 = arith.subf %17, %20 : vector<1x128xf32>
      %22 = vector.broadcast %6 : f32 to vector<1x128xf32>
      %23 = arith.subf %18, %22 : vector<1x128xf32>
      %c0_11 = arith.constant 0 : index
      %c0_12 = arith.constant 0 : index
      %24 = vector.load %arg6[%c0_11, %c0_12] : memref<1x768xf32, #tpu.memory_space<vmem>>, vector<1x128xf32>
      %25 = arith.mulf %19, %19 : vector<1x128xf32>
      %cst = arith.constant dense<0.000000e+00> : vector<128xf32>
      %26 = vector.multi_reduction <add>, %25, %cst [0] : vector<1x128xf32> to vector<128xf32>
      %27 = vector.shape_cast %26 : vector<128xf32> to vector<1x128xf32>
      %28 = arith.addf %24, %27 : vector<1x128xf32>
      %c0_13 = arith.constant 0 : index
      %c0_14 = arith.constant 0 : index
      %29 = vector.load %arg6[%c0_13, %c0_14] : memref<1x768xf32, #tpu.memory_space<vmem>>, vector<1x128xf32>
      tpu.vector_store %arg6[%c0_13, %c0_14], %28 {strides = array<i32>} : memref<1x768xf32, #tpu.memory_space<vmem>>, vector<1x128xf32>,
      %c0_15 = arith.constant 0 : index
      %c128 = arith.constant 128 : index
      %30 = vector.load %arg6[%c0_15, %c128] : memref<1x768xf32, #tpu.memory_space<vmem>>, vector<1x128xf32>
      %cst_16 = arith.constant dense<0.000000e+00> : vector<128xf32>
      %31 = vector.multi_reduction <add>, %21, %cst_16 [0] : vector<1x128xf32> to vector<128xf32>
      %32 = vector.shape_cast %31 : vector<128xf32> to vector<1x128xf32>
      %33 = arith.addf %30, %32 : vector<1x128xf32>
      %c0_17 = arith.constant 0 : index
      %c128_18 = arith.constant 128 : index
      %34 = vector.load %arg6[%c0_17, %c128_18] : memref<1x768xf32, #tpu.memory_space<vmem>>, vector<1x128xf32>
      tpu.vector_store %arg6[%c0_17, %c128_18], %33 {strides = array<i32>} : memref<1x768xf32, #tpu.memory_space<vmem>>, vector<1x128xf32>,
      %c0_19 = arith.constant 0 : index
      %c256 = arith.constant 256 : index
      %35 = vector.load %arg6[%c0_19, %c256] : memref<1x768xf32, #tpu.memory_space<vmem>>, vector<1x128xf32>
      %cst_20 = arith.constant dense<0.000000e+00> : vector<128xf32>
      %36 = vector.multi_reduction <add>, %23, %cst_20 [0] : vector<1x128xf32> to vector<128xf32>
      %37 = vector.shape_cast %36 : vector<128xf32> to vector<1x128xf32>
      %38 = arith.addf %35, %37 : vector<1x128xf32>
      %c0_21 = arith.constant 0 : index
      %c256_22 = arith.constant 256 : index
      %39 = vector.load %arg6[%c0_21, %c256_22] : memref<1x768xf32, #tpu.memory_space<vmem>>, vector<1x128xf32>
      tpu.vector_store %arg6[%c0_21, %c256_22], %38 {strides = array<i32>} : memref<1x768xf32, #tpu.memory_space<vmem>>, vector<1x128xf32>,
      %c0_23 = arith.constant 0 : index
      %c384 = arith.constant 384 : index
      %40 = vector.load %arg6[%c0_23, %c384] : memref<1x768xf32, #tpu.memory_space<vmem>>, vector<1x128xf32>
      %41 = arith.mulf %21, %23 : vector<1x128xf32>
      %cst_24 = arith.constant dense<0.000000e+00> : vector<128xf32>
      %42 = vector.multi_reduction <add>, %41, %cst_24 [0] : vector<1x128xf32> to vector<128xf32>
      %43 = vector.shape_cast %42 : vector<128xf32> to vector<1x128xf32>
      %44 = arith.addf %40, %43 : vector<1x128xf32>
      %c0_25 = arith.constant 0 : index
      %c384_26 = arith.constant 384 : index
      %45 = vector.load %arg6[%c0_25, %c384_26] : memref<1x768xf32, #tpu.memory_space<vmem>>, vector<1x128xf32>
      tpu.vector_store %arg6[%c0_25, %c384_26], %44 {strides = array<i32>} : memref<1x768xf32, #tpu.memory_space<vmem>>, vector<1x128xf32>,
      %c0_27 = arith.constant 0 : index
      %c512 = arith.constant 512 : index
      %46 = vector.load %arg6[%c0_27, %c512] : memref<1x768xf32, #tpu.memory_space<vmem>>, vector<1x128xf32>
      %47 = arith.mulf %21, %21 : vector<1x128xf32>
      %cst_28 = arith.constant dense<0.000000e+00> : vector<128xf32>
      %48 = vector.multi_reduction <add>, %47, %cst_28 [0] : vector<1x128xf32> to vector<128xf32>
      %49 = vector.shape_cast %48 : vector<128xf32> to vector<1x128xf32>
      %50 = arith.addf %46, %49 : vector<1x128xf32>
      %c0_29 = arith.constant 0 : index
      %c512_30 = arith.constant 512 : index
      %51 = vector.load %arg6[%c0_29, %c512_30] : memref<1x768xf32, #tpu.memory_space<vmem>>, vector<1x128xf32>
      tpu.vector_store %arg6[%c0_29, %c512_30], %50 {strides = array<i32>} : memref<1x768xf32, #tpu.memory_space<vmem>>, vector<1x128xf32>,
      %c0_31 = arith.constant 0 : index
      %c640 = arith.constant 640 : index
      %52 = vector.load %arg6[%c0_31, %c640] : memref<1x768xf32, #tpu.memory_space<vmem>>, vector<1x128xf32>
      %53 = arith.mulf %23, %23 : vector<1x128xf32>
      %cst_32 = arith.constant dense<0.000000e+00> : vector<128xf32>
      %54 = vector.multi_reduction <add>, %53, %cst_32 [0] : vector<1x128xf32> to vector<128xf32>
      %55 = vector.shape_cast %54 : vector<128xf32> to vector<1x128xf32>
      %56 = arith.addf %52, %55 : vector<1x128xf32>
      %c0_33 = arith.constant 0 : index
      %c640_34 = arith.constant 640 : index
      %57 = vector.load %arg6[%c0_33, %c640_34] : memref<1x768xf32, #tpu.memory_space<vmem>>, vector<1x128xf32>
      tpu.vector_store %arg6[%c0_33, %c640_34], %56 {strides = array<i32>} : memref<1x768xf32, #tpu.memory_space<vmem>>, vector<1x128xf32>,
      %c0_35 = arith.constant 0 : index
      %c0_36 = arith.constant 0 : index
      %58 = vector.load %arg7[%c0_35, %c0_36] : memref<1x256xf32, #tpu.memory_space<vmem>>, vector<1x128xf32>
      %cst_37 = arith.constant dense<0x7F800000> : vector<128xf32>
      %59 = vector.multi_reduction <minimumf>, %17, %cst_37 [0] : vector<1x128xf32> to vector<128xf32>
      %60 = vector.shape_cast %59 : vector<128xf32> to vector<1x128xf32>
      %61 = arith.minimumf %58, %60 : vector<1x128xf32>
      %c0_38 = arith.constant 0 : index
      %c0_39 = arith.constant 0 : index
      %62 = vector.load %arg7[%c0_38, %c0_39] : memref<1x256xf32, #tpu.memory_space<vmem>>, vector<1x128xf32>
      tpu.vector_store %arg7[%c0_38, %c0_39], %61 {strides = array<i32>} : memref<1x256xf32, #tpu.memory_space<vmem>>, vector<1x128xf32>,
      %c0_40 = arith.constant 0 : index
      %c128_41 = arith.constant 128 : index
      %63 = vector.load %arg7[%c0_40, %c128_41] : memref<1x256xf32, #tpu.memory_space<vmem>>, vector<1x128xf32>
      %cst_42 = arith.constant dense<0x7F800000> : vector<128xf32>
      %64 = vector.multi_reduction <minimumf>, %18, %cst_42 [0] : vector<1x128xf32> to vector<128xf32>
      %65 = vector.shape_cast %64 : vector<128xf32> to vector<1x128xf32>
      %66 = arith.minimumf %63, %65 : vector<1x128xf32>
      %c0_43 = arith.constant 0 : index
      %c128_44 = arith.constant 128 : index
      %67 = vector.load %arg7[%c0_43, %c128_44] : memref<1x256xf32, #tpu.memory_space<vmem>>, vector<1x128xf32>
      tpu.vector_store %arg7[%c0_43, %c128_44], %66 {strides = array<i32>} : memref<1x256xf32, #tpu.memory_space<vmem>>, vector<1x128xf32>,
      %c0_45 = arith.constant 0 : index
      %c0_46 = arith.constant 0 : index
      %68 = vector.load %arg8[%c0_45, %c0_46] : memref<1x256xf32, #tpu.memory_space<vmem>>, vector<1x128xf32>
      %cst_47 = arith.constant dense<0xFF800000> : vector<128xf32>
      %69 = vector.multi_reduction <maximumf>, %17, %cst_47 [0] : vector<1x128xf32> to vector<128xf32>
      %70 = vector.shape_cast %69 : vector<128xf32> to vector<1x128xf32>
      %71 = arith.maximumf %68, %70 : vector<1x128xf32>
      %c0_48 = arith.constant 0 : index
      %c0_49 = arith.constant 0 : index
      %72 = vector.load %arg8[%c0_48, %c0_49] : memref<1x256xf32, #tpu.memory_space<vmem>>, vector<1x128xf32>
      tpu.vector_store %arg8[%c0_48, %c0_49], %71 {strides = array<i32>} : memref<1x256xf32, #tpu.memory_space<vmem>>, vector<1x128xf32>,
      %c0_50 = arith.constant 0 : index
      %c128_51 = arith.constant 128 : index
      %73 = vector.load %arg8[%c0_50, %c128_51] : memref<1x256xf32, #tpu.memory_space<vmem>>, vector<1x128xf32>
      %cst_52 = arith.constant dense<0xFF800000> : vector<128xf32>
      %74 = vector.multi_reduction <maximumf>, %18, %cst_52 [0] : vector<1x128xf32> to vector<128xf32>
      %75 = vector.shape_cast %74 : vector<128xf32> to vector<1x128xf32>
      %76 = arith.maximumf %73, %75 : vector<1x128xf32>
      %c0_53 = arith.constant 0 : index
      %c128_54 = arith.constant 128 : index
      %77 = vector.load %arg8[%c0_53, %c128_54] : memref<1x256xf32, #tpu.memory_space<vmem>>, vector<1x128xf32>
      tpu.vector_store %arg8[%c0_53, %c128_54], %76 {strides = array<i32>} : memref<1x256xf32, #tpu.memory_space<vmem>>, vector<1x128xf32>,
    } else {
    }
    %true = arith.constant true
    %14 = arith.xori %11, %true : i1
    %15 = arith.extui %14 : i1 to i32
    %c0_i32_6 = arith.constant 0 : i32
    %16 = arith.cmpi ne, %15, %c0_i32_6 : i32
    scf.if %16 {
      %c0_7 = arith.constant 0 : index
      %c0_8 = arith.constant 0 : index
      %17 = vector.load %arg4[%c0_7, %c0_8] : memref<1x128xf32, #tpu.memory_space<vmem>>, vector<1x128xf32>
      %c0_9 = arith.constant 0 : index
      %c0_10 = arith.constant 0 : index
      %18 = vector.load %arg5[%c0_9, %c0_10] : memref<1x128xf32, #tpu.memory_space<vmem>>, vector<1x128xf32>
      %19 = tpu.iota {dimensions = array<i32: 0>} : vector<1x128xi32>
      %20 = vector.broadcast %9 : i32 to vector<1x128xi32>
      %21 = arith.addi %20, %19 : vector<1x128xi32>
      %22 = tpu.iota {dimensions = array<i32: 1>} : vector<1x128xi32>
      %23 = vector.broadcast %3 : i32 to vector<1x128xi32>
      %24 = arith.cmpi slt, %21, %23 : vector<1x128xi32>
      %25 = vector.broadcast %3 : i32 to vector<1x128xi32>
      %26 = arith.cmpi eq, %21, %25 : vector<1x128xi32>
      %27 = vector.broadcast %4 : i32 to vector<1x128xi32>
      %28 = arith.cmpi slt, %22, %27 : vector<1x128xi32>
      %29 = arith.andi %26, %28 : vector<1x128xi1>
      %30 = arith.ori %24, %29 : vector<1x128xi1>
      %31 = arith.subf %17, %18 : vector<1x128xf32>
      %cst = arith.constant 0.000000e+00 : f32
      %32 = vector.broadcast %cst : f32 to vector<1x128xf32>
      %33 = arith.select %30, %31, %32 : vector<1x128xi1>, vector<1x128xf32>
      %34 = vector.broadcast %5 : f32 to vector<1x128xf32>
      %35 = arith.subf %17, %34 : vector<1x128xf32>
      %cst_11 = arith.constant 0.000000e+00 : f32
      %36 = vector.broadcast %cst_11 : f32 to vector<1x128xf32>
      %37 = arith.select %30, %35, %36 : vector<1x128xi1>, vector<1x128xf32>
      %38 = vector.broadcast %6 : f32 to vector<1x128xf32>
      %39 = arith.subf %18, %38 : vector<1x128xf32>
      %cst_12 = arith.constant 0.000000e+00 : f32
      %40 = vector.broadcast %cst_12 : f32 to vector<1x128xf32>
      %41 = arith.select %30, %39, %40 : vector<1x128xi1>, vector<1x128xf32>
      %cst_13 = arith.constant 0x7F800000 : f32
      %42 = vector.broadcast %cst_13 : f32 to vector<1x128xf32>
      %43 = arith.select %30, %17, %42 : vector<1x128xi1>, vector<1x128xf32>
      %cst_14 = arith.constant 0.000000e+00 : f32
      %cst_15 = arith.constant 0x7F800000 : f32
      %44 = arith.subf %cst_14, %cst_15 : f32
      %45 = vector.broadcast %44 : f32 to vector<1x128xf32>
      %46 = arith.select %30, %17, %45 : vector<1x128xi1>, vector<1x128xf32>
      %cst_16 = arith.constant 0x7F800000 : f32
      %47 = vector.broadcast %cst_16 : f32 to vector<1x128xf32>
      %48 = arith.select %30, %18, %47 : vector<1x128xi1>, vector<1x128xf32>
      %cst_17 = arith.constant 0.000000e+00 : f32
      %cst_18 = arith.constant 0x7F800000 : f32
      %49 = arith.subf %cst_17, %cst_18 : f32
      %50 = vector.broadcast %49 : f32 to vector<1x128xf32>
      %51 = arith.select %30, %18, %50 : vector<1x128xi1>, vector<1x128xf32>
      %c0_19 = arith.constant 0 : index
      %c0_20 = arith.constant 0 : index
      %52 = vector.load %arg6[%c0_19, %c0_20] : memref<1x768xf32, #tpu.memory_space<vmem>>, vector<1x128xf32>
      %53 = arith.mulf %33, %33 : vector<1x128xf32>
      %cst_21 = arith.constant dense<0.000000e+00> : vector<128xf32>
      %54 = vector.multi_reduction <add>, %53, %cst_21 [0] : vector<1x128xf32> to vector<128xf32>
      %55 = vector.shape_cast %54 : vector<128xf32> to vector<1x128xf32>
      %56 = arith.addf %52, %55 : vector<1x128xf32>
      %c0_22 = arith.constant 0 : index
      %c0_23 = arith.constant 0 : index
      %57 = vector.load %arg6[%c0_22, %c0_23] : memref<1x768xf32, #tpu.memory_space<vmem>>, vector<1x128xf32>
      tpu.vector_store %arg6[%c0_22, %c0_23], %56 {strides = array<i32>} : memref<1x768xf32, #tpu.memory_space<vmem>>, vector<1x128xf32>,
      %c0_24 = arith.constant 0 : index
      %c128 = arith.constant 128 : index
      %58 = vector.load %arg6[%c0_24, %c128] : memref<1x768xf32, #tpu.memory_space<vmem>>, vector<1x128xf32>
      %cst_25 = arith.constant dense<0.000000e+00> : vector<128xf32>
      %59 = vector.multi_reduction <add>, %37, %cst_25 [0] : vector<1x128xf32> to vector<128xf32>
      %60 = vector.shape_cast %59 : vector<128xf32> to vector<1x128xf32>
      %61 = arith.addf %58, %60 : vector<1x128xf32>
      %c0_26 = arith.constant 0 : index
      %c128_27 = arith.constant 128 : index
      %62 = vector.load %arg6[%c0_26, %c128_27] : memref<1x768xf32, #tpu.memory_space<vmem>>, vector<1x128xf32>
      tpu.vector_store %arg6[%c0_26, %c128_27], %61 {strides = array<i32>} : memref<1x768xf32, #tpu.memory_space<vmem>>, vector<1x128xf32>,
      %c0_28 = arith.constant 0 : index
      %c256 = arith.constant 256 : index
      %63 = vector.load %arg6[%c0_28, %c256] : memref<1x768xf32, #tpu.memory_space<vmem>>, vector<1x128xf32>
      %cst_29 = arith.constant dense<0.000000e+00> : vector<128xf32>
      %64 = vector.multi_reduction <add>, %41, %cst_29 [0] : vector<1x128xf32> to vector<128xf32>
      %65 = vector.shape_cast %64 : vector<128xf32> to vector<1x128xf32>
      %66 = arith.addf %63, %65 : vector<1x128xf32>
      %c0_30 = arith.constant 0 : index
      %c256_31 = arith.constant 256 : index
      %67 = vector.load %arg6[%c0_30, %c256_31] : memref<1x768xf32, #tpu.memory_space<vmem>>, vector<1x128xf32>
      tpu.vector_store %arg6[%c0_30, %c256_31], %66 {strides = array<i32>} : memref<1x768xf32, #tpu.memory_space<vmem>>, vector<1x128xf32>,
      %c0_32 = arith.constant 0 : index
      %c384 = arith.constant 384 : index
      %68 = vector.load %arg6[%c0_32, %c384] : memref<1x768xf32, #tpu.memory_space<vmem>>, vector<1x128xf32>
      %69 = arith.mulf %37, %41 : vector<1x128xf32>
      %cst_33 = arith.constant dense<0.000000e+00> : vector<128xf32>
      %70 = vector.multi_reduction <add>, %69, %cst_33 [0] : vector<1x128xf32> to vector<128xf32>
      %71 = vector.shape_cast %70 : vector<128xf32> to vector<1x128xf32>
      %72 = arith.addf %68, %71 : vector<1x128xf32>
      %c0_34 = arith.constant 0 : index
      %c384_35 = arith.constant 384 : index
      %73 = vector.load %arg6[%c0_34, %c384_35] : memref<1x768xf32, #tpu.memory_space<vmem>>, vector<1x128xf32>
      tpu.vector_store %arg6[%c0_34, %c384_35], %72 {strides = array<i32>} : memref<1x768xf32, #tpu.memory_space<vmem>>, vector<1x128xf32>,
      %c0_36 = arith.constant 0 : index
      %c512 = arith.constant 512 : index
      %74 = vector.load %arg6[%c0_36, %c512] : memref<1x768xf32, #tpu.memory_space<vmem>>, vector<1x128xf32>
      %75 = arith.mulf %37, %37 : vector<1x128xf32>
      %cst_37 = arith.constant dense<0.000000e+00> : vector<128xf32>
      %76 = vector.multi_reduction <add>, %75, %cst_37 [0] : vector<1x128xf32> to vector<128xf32>
      %77 = vector.shape_cast %76 : vector<128xf32> to vector<1x128xf32>
      %78 = arith.addf %74, %77 : vector<1x128xf32>
      %c0_38 = arith.constant 0 : index
      %c512_39 = arith.constant 512 : index
      %79 = vector.load %arg6[%c0_38, %c512_39] : memref<1x768xf32, #tpu.memory_space<vmem>>, vector<1x128xf32>
      tpu.vector_store %arg6[%c0_38, %c512_39], %78 {strides = array<i32>} : memref<1x768xf32, #tpu.memory_space<vmem>>, vector<1x128xf32>,
      %c0_40 = arith.constant 0 : index
      %c640 = arith.constant 640 : index
      %80 = vector.load %arg6[%c0_40, %c640] : memref<1x768xf32, #tpu.memory_space<vmem>>, vector<1x128xf32>
      %81 = arith.mulf %41, %41 : vector<1x128xf32>
      %cst_41 = arith.constant dense<0.000000e+00> : vector<128xf32>
      %82 = vector.multi_reduction <add>, %81, %cst_41 [0] : vector<1x128xf32> to vector<128xf32>
      %83 = vector.shape_cast %82 : vector<128xf32> to vector<1x128xf32>
      %84 = arith.addf %80, %83 : vector<1x128xf32>
      %c0_42 = arith.constant 0 : index
      %c640_43 = arith.constant 640 : index
      %85 = vector.load %arg6[%c0_42, %c640_43] : memref<1x768xf32, #tpu.memory_space<vmem>>, vector<1x128xf32>
      tpu.vector_store %arg6[%c0_42, %c640_43], %84 {strides = array<i32>} : memref<1x768xf32, #tpu.memory_space<vmem>>, vector<1x128xf32>,
      %c0_44 = arith.constant 0 : index
      %c0_45 = arith.constant 0 : index
      %86 = vector.load %arg7[%c0_44, %c0_45] : memref<1x256xf32, #tpu.memory_space<vmem>>, vector<1x128xf32>
      %cst_46 = arith.constant dense<0x7F800000> : vector<128xf32>
      %87 = vector.multi_reduction <minimumf>, %43, %cst_46 [0] : vector<1x128xf32> to vector<128xf32>
      %88 = vector.shape_cast %87 : vector<128xf32> to vector<1x128xf32>
      %89 = arith.minimumf %86, %88 : vector<1x128xf32>
      %c0_47 = arith.constant 0 : index
      %c0_48 = arith.constant 0 : index
      %90 = vector.load %arg7[%c0_47, %c0_48] : memref<1x256xf32, #tpu.memory_space<vmem>>, vector<1x128xf32>
      tpu.vector_store %arg7[%c0_47, %c0_48], %89 {strides = array<i32>} : memref<1x256xf32, #tpu.memory_space<vmem>>, vector<1x128xf32>,
      %c0_49 = arith.constant 0 : index
      %c128_50 = arith.constant 128 : index
      %91 = vector.load %arg7[%c0_49, %c128_50] : memref<1x256xf32, #tpu.memory_space<vmem>>, vector<1x128xf32>
      %cst_51 = arith.constant dense<0x7F800000> : vector<128xf32>
      %92 = vector.multi_reduction <minimumf>, %48, %cst_51 [0] : vector<1x128xf32> to vector<128xf32>
      %93 = vector.shape_cast %92 : vector<128xf32> to vector<1x128xf32>
      %94 = arith.minimumf %91, %93 : vector<1x128xf32>
      %c0_52 = arith.constant 0 : index
      %c128_53 = arith.constant 128 : index
      %95 = vector.load %arg7[%c0_52, %c128_53] : memref<1x256xf32, #tpu.memory_space<vmem>>, vector<1x128xf32>
      tpu.vector_store %arg7[%c0_52, %c128_53], %94 {strides = array<i32>} : memref<1x256xf32, #tpu.memory_space<vmem>>, vector<1x128xf32>,
      %c0_54 = arith.constant 0 : index
      %c0_55 = arith.constant 0 : index
      %96 = vector.load %arg8[%c0_54, %c0_55] : memref<1x256xf32, #tpu.memory_space<vmem>>, vector<1x128xf32>
      %cst_56 = arith.constant dense<0xFF800000> : vector<128xf32>
      %97 = vector.multi_reduction <maximumf>, %46, %cst_56 [0] : vector<1x128xf32> to vector<128xf32>
      %98 = vector.shape_cast %97 : vector<128xf32> to vector<1x128xf32>
      %99 = arith.maximumf %96, %98 : vector<1x128xf32>
      %c0_57 = arith.constant 0 : index
      %c0_58 = arith.constant 0 : index
      %100 = vector.load %arg8[%c0_57, %c0_58] : memref<1x256xf32, #tpu.memory_space<vmem>>, vector<1x128xf32>
      tpu.vector_store %arg8[%c0_57, %c0_58], %99 {strides = array<i32>} : memref<1x256xf32, #tpu.memory_space<vmem>>, vector<1x128xf32>,
      %c0_59 = arith.constant 0 : index
      %c128_60 = arith.constant 128 : index
      %101 = vector.load %arg8[%c0_59, %c128_60] : memref<1x256xf32, #tpu.memory_space<vmem>>, vector<1x128xf32>
      %cst_61 = arith.constant dense<0xFF800000> : vector<128xf32>
      %102 = vector.multi_reduction <maximumf>, %51, %cst_61 [0] : vector<1x128xf32> to vector<128xf32>
      %103 = vector.shape_cast %102 : vector<128xf32> to vector<1x128xf32>
      %104 = arith.maximumf %101, %103 : vector<1x128xf32>
      %c0_62 = arith.constant 0 : index
      %c128_63 = arith.constant 128 : index
      %105 = vector.load %arg8[%c0_62, %c128_63] : memref<1x256xf32, #tpu.memory_space<vmem>>, vector<1x128xf32>
      tpu.vector_store %arg8[%c0_62, %c128_63], %104 {strides = array<i32>} : memref<1x256xf32, #tpu.memory_space<vmem>>, vector<1x128xf32>,
    } else {
    }
    return
  }
  func.func @transform_0(%arg0: i32, %arg1: i32) -> i32 {
    %c0_i32 = arith.constant 0 : i32
    %c0_i32_0 = arith.constant 0 : i32
    return %c0_i32 : i32
  }
  func.func @transform_1(%arg0: i32, %arg1: i32) -> i32 {
    %c0_i32 = arith.constant 0 : i32
    %c0_i32_0 = arith.constant 0 : i32
    return %c0_i32 : i32
  }
  func.func @transform_2(%arg0: i32, %arg1: i32) -> (i32, i32) {
    %c1_i32 = arith.constant 1 : i32
    %0 = arith.muli %arg0, %c1_i32 : i32
    %1 = arith.addi %0, %arg1 : i32
    %c0_i32 = arith.constant 0 : i32
    %2 = arith.minsi %1, %c0_i32 : i32
    %c0_i32_0 = arith.constant 0 : i32
    %c0_i32_1 = arith.constant 0 : i32
    return %2, %c0_i32_0 : i32, i32
  }
  func.func @transform_3(%arg0: i32, %arg1: i32) -> (i32, i32) {
    %c1_i32 = arith.constant 1 : i32
    %0 = arith.muli %arg0, %c1_i32 : i32
    %1 = arith.addi %0, %arg1 : i32
    %c0_i32 = arith.constant 0 : i32
    %2 = arith.minsi %1, %c0_i32 : i32
    %c0_i32_0 = arith.constant 0 : i32
    %c0_i32_1 = arith.constant 0 : i32
    return %2, %c0_i32_0 : i32, i32
  }
  func.func @transform_4(%arg0: i32, %arg1: i32) -> (i32, i32) {
    %c0_i32 = arith.constant 0 : i32
    %c0_i32_0 = arith.constant 0 : i32
    return %arg0, %c0_i32 : i32, i32
  }
  func.func @transform_5(%arg0: i32, %arg1: i32) -> (i32, i32) {
    %c0_i32 = arith.constant 0 : i32
    %c0_i32_0 = arith.constant 0 : i32
    return %arg0, %c0_i32 : i32, i32
  }
  func.func @transform_6(%arg0: i32, %arg1: i32) -> (i32, i32) {
    %c0_i32 = arith.constant 0 : i32
    %c0_i32_0 = arith.constant 0 : i32
    return %arg0, %c0_i32 : i32, i32
  }
}

</mosaic_0001>

<bundles_post_ra>
// kernel: tpu_custom_call.1
= control target key start
LH: loop header
LB: loop body
LE: loop exit
PB: predicated region body
PF: predicated region fallthrough
CT: control target
= control target key end

     0   :  { %12 = vsyncpa [#allocation4], 0  ;;  %s595_s0 = inlined_call_operand.hbm [shape: s32[2], index: 0, kind: input, shape index: {}]   ;;  %s596_s1 = inlined_call_operand.vmem [shape: f32[2], index: 1, kind: input, shape index: {}]   ;;  %s597_s2 = inlined_call_operand.vmem [shape: f32[1,128], index: 2, kind: input, shape index: {}]   ;;  %s598_s3 = inlined_call_operand.vmem [shape: f32[1,128], index: 3, kind: input, shape index: {}]   ;;  %s599_s4 = inlined_call_operand.hbm [shape: f32[1,768], index: 4, kind: output, shape index: {0}]   ;;  %s600_s5 = inlined_call_operand.hbm [shape: f32[1,256], index: 5, kind: output, shape index: {1}]   ;;  %s601_s6 = inlined_call_operand.hbm [shape: f32[1,256], index: 6, kind: output, shape index: {2}]  }
   0x1   :  { %13 = vsyncpa [#allocation5], 0 }
   0x2   :  { %14 = vsyncpa [#allocation3], 0 }
   0x3   :  { %15 = vsyncpa [#allocation9], 0  ;;  %s30_s23 = sshll.u32 %s596_s1, 4  ;;  %s305_s26 = scalar_lea.hbm %s595_s0, 16  ;;  %s31_s23 = int_to_ptr.vmem [resolvable:$true] %s30_s23 }
   0x4   :  { %p306_p0 = scmp.ne.s32.totalorder %s595_s0, %s305_s26  ;;  %p309_p1 = scmp.lt.u32.totalorder %s305_s26, %s595_s0 }
   0x6   :  { %p311_p2 = pnand %p309_p1, %p306_p0 }
   0x8   :  { %314 = shalt.err (!%p311_p2)
}
   0x9   :  { %s401_s7 = smov [#allocation2]   ;;  %s315_s1 = scalar_lea.vmem %s31_s23, 16 }
   0xa   :  { %23 = dma.hbm_to_smem %s595_s0, 16, %s401_s7, [#allocation4]  }
   0xb   :  { %p316_p3 = scmp.ne.s32.totalorder %s31_s23, %s315_s1  ;;  %p320_p4 = scmp.lt.s32.totalorder %s31_s23, %s31_s23 }
   0xc   :  { %p321_p5 = scmp.lt.s32.totalorder %s315_s1, %s315_s1 }
   0xe   :  { %p322_p6 = por %p321_p5, %p320_p4 }
  0x10   :  { %p323_p7 = pnand %p322_p6, %p316_p3 }
  0x12   :  { %326 = shalt.err (!%p323_p7)
}
  0x13   :  { %s402_s10 = smov [#allocation6]  }
  0x14   :  { %33 = dma.vmem_to_smem %s31_s23, 16, %s402_s10, [#allocation5]  }
  0x15   :  { %393 = dma.done.wait [#allocation4], 16  }
  0x16   :  { %394 = vsyncadd [#allocation4], 4294967280 }
  0x17   :  { %395 = dma.done.wait [#allocation5], 16  }
  0x18   :  { %396 = vsyncadd [#allocation5], 4294967280 }
  0x19   :  { %62 = sfence }
  0x1a   :  { %v97_v0 = vlaneseq  ;;  %s459_s11 = sld [smem:[#allocation2]]  ;;  %s461_s12 = sld [smem:[#allocation2 + $0x1]]  ;;  %v403_v1 = vmov 0.0   ;;  %v404_v2 = vmov inf   ;;  %v405_v3 = vmov -inf  }
  0x1b   :  { %s463_s0 = sld [smem:[#allocation6]]  ;;  %s467_s13 = sld [smem:[#allocation6 + $0x1]] }
  0x1c   :  { %vm99_vm0 = vcmp.lt.s32.totalorder %v97_v0, 768  ;;  %vm102_vm1 = vcmp.lt.s32.totalorder %v97_v0, 256 }
  0x1d   :  { %101 = vst.msk [vmem:[#allocation7] sm:$0x3f] %vm99_vm0, %v403_v1 }
  0x1e   :  { %104 = vst.msk [vmem:[#allocation8] sm:$0x3] %vm102_vm1, %v404_v2  ;;  %105 = vst.msk [vmem:[#allocation10] sm:$0x3] %vm102_vm1, %v405_v3 }
  0x20   :  { %p294_p8 = scmp.lt.s32.totalorder %s459_s11, 1 }
  0x21   :  { %v116_v4 = vld [vmem:[%s597_s2] sm:$0x1] (!%p294_p8)  ;;  %v119_v7 = vstv (!%p294_p8), %s463_s0  ;;  %v121_v8 = vstv (!%p294_p8), %s467_s13  ;;  %vm479_vm2 = vcmp.lt.s32.totalorder (!%p294_p8), %v97_v0, 128 }
  0x22   :  { %115 = sbr.rel (%p294_p8) target bundleno = 45 (0x2d), region = 33  ;;  %v117_v5 = vld [vmem:[%s598_s3] sm:$0x1] (!%p294_p8)  ;;  %v120_v11 = vsub.f32 (!%p294_p8), %v116_v4, %v119_v7 }
  0x23   :  { %v118_v9 = vsub.f32 (!%p294_p8), %v116_v4, %v117_v5  ;;  %v122_v13 = vsub.f32 (!%p294_p8), %v117_v5, %v121_v8 }
  0x24   :  { %v123_v6 = vld [vmem:[#allocation7] sm:$0x1] (!%p294_p8)  ;;  %v132_v12 = vld [vmem:[#allocation7 + $0x1] sm:$0x1] (!%p294_p8)  ;;  %v136_v14 = vld [vmem:[#allocation7 + $0x2] sm:$0x1] (!%p294_p8)  ;;  %v146_v25 = vmul.f32 (!%p294_p8), %v120_v11, %v120_v11 }
  0x25   :  { %v140_v15 = vld [vmem:[#allocation7 + $0x3] sm:$0x1] (!%p294_p8)  ;;  %v145_v16 = vld [vmem:[#allocation7 + $0x4] sm:$0x1] (!%p294_p8)  ;;  %v150_v17 = vld [vmem:[#allocation7 + $0x5] sm:$0x1] (!%p294_p8)  ;;  %v124_v18 = vmul.f32 (!%p294_p8), %v118_v9, %v118_v9  ;;  %v134_v19 = vadd.f32 (!%p294_p8), %v132_v12, %v120_v11  ;;  %v138_v20 = vadd.f32 (!%p294_p8), %v136_v14, %v122_v13  ;;  %v141_v21 = vmul.f32 (!%p294_p8), %v122_v13, %v120_v11 }
  0x26   :  { %v155_v22 = vld [vmem:[#allocation8] sm:$0x1] (!%p294_p8)  ;;  %v158_v23 = vld [vmem:[#allocation8 + $0x1] sm:$0x1] (!%p294_p8)  ;;  %v161_v24 = vld [vmem:[#allocation10] sm:$0x1] (!%p294_p8)  ;;  %v151_v26 = vmul.f32 (!%p294_p8), %v122_v13, %v122_v13  ;;  %v148_v34 = vadd.f32 (!%p294_p8), %v146_v25, %v145_v16 }
  0x27   :  { %v156_v27 = vmin.f32 (!%p294_p8), %v155_v22, %v116_v4  ;;  %v159_v28 = vmin.f32 (!%p294_p8), %v158_v23, %v117_v5  ;;  %v164_v29 = vld [vmem:[#allocation10 + $0x1] sm:$0x1] (!%p294_p8)  ;;  %v126_v30 = vadd.f32 (!%p294_p8), %v124_v18, %v123_v6  ;;  %135 = vst.msk [vmem:[#allocation7 + $0x1] sm:$0x1] (!%p294_p8), %vm479_vm2, %v134_v19  ;;  %139 = vst.msk [vmem:[#allocation7 + $0x2] sm:$0x1] (!%p294_p8), %vm479_vm2, %v138_v20 }
  0x28   :  { %v143_v31 = vadd.f32 (!%p294_p8), %v141_v21, %v140_v15  ;;  %v162_v32 = vmax.f32 (!%p294_p8), %v161_v24, %v116_v4  ;;  %v165_v33 = vmax.f32 (!%p294_p8), %v164_v29, %v117_v5  ;;  %v153_v35 = vadd.f32 (!%p294_p8), %v151_v26, %v150_v17  ;;  %149 = vst.msk [vmem:[#allocation7 + $0x4] sm:$0x1] (!%p294_p8), %vm479_vm2, %v148_v34 }
  0x29   :  { %157 = vst.msk [vmem:[#allocation8] sm:$0x1] %vm479_vm2, %v156_v27  ;;  %160 = vst.msk [vmem:[#allocation8 + $0x1] sm:$0x1] %vm479_vm2, %v159_v28 }
  0x2a   :  { %131 = vst.msk [vmem:[#allocation7] sm:$0x1] %vm479_vm2, %v126_v30  ;;  %144 = vst.msk [vmem:[#allocation7 + $0x3] sm:$0x1] %vm479_vm2, %v143_v31 }
  0x2b   :  { %163 = vst.msk [vmem:[#allocation10] sm:$0x1] %vm479_vm2, %v162_v32  ;;  %166 = vst.msk [vmem:[#allocation10 + $0x1] sm:$0x1] %vm479_vm2, %v165_v33 }
  0x2c   :  { %154 = vst.msk [vmem:[#allocation7 + $0x5] sm:$0x1] %vm479_vm2, %v153_v35 }
  0x2d PF:  { %p296_p9 = scmp.ge.s32.totalorder %s459_s11, 1 }
  0x2e   :  { %v171_v36 = vld [vmem:[%s597_s2] sm:$0x1] (!%p296_p9)  ;;  %v174_v38 = vshrl.u32 (!%p296_p9), %v97_v0, 7  ;;  %v178_v39 = vand.u32 (!%p296_p9), 127, %v97_v0  ;;  %v179_v40 = vstv (!%p296_p9), %s459_s11  ;;  %v182_v41 = vstv (!%p296_p9), %s461_s12 }
  0x2f   :  { %170 = sbr.rel (%p296_p9) target bundleno = 60 (0x3c), region = 37  ;;  %v172_v37 = vld [vmem:[%s598_s3] sm:$0x1] (!%p296_p9)  ;;  %v188_v43 = vstv (!%p296_p9), %s463_s0  ;;  %v191_v44 = vstv (!%p296_p9), %s467_s13  ;;  %vm521_vm8 = vcmp.lt.s32.totalorder (!%p296_p9), %v97_v0, 128 }
  0x30   :  { %v186_v42 = vsub.f32 (!%p296_p9), %v171_v36, %v172_v37  ;;  %vm180_vm3 = vcmp.lt.s32.totalorder (!%p296_p9), %v174_v38, %v179_v40  ;;  %vm181_vm4 = vcmp.eq.s32.totalorder (!%p296_p9), %v174_v38, %v179_v40  ;;  %vm183_vm5 = vcmp.lt.s32.totalorder (!%p296_p9), %v178_v39, %v182_v41 }
  0x31   :  { %v189_v45 = vsub.f32 (!%p296_p9), %v171_v36, %v188_v43  ;;  %vm184_vm6 = vmand (!%p296_p9), %vm181_vm4, %vm183_vm5  ;;  %v198_v46 = vld [vmem:[#allocation7] sm:$0x1] (!%p296_p9)  ;;  %v192_v48 = vsub.f32 (!%p296_p9), %v172_v37, %v191_v44  ;;  %v215_v52 = vld [vmem:[#allocation7 + $0x3] sm:$0x1] (!%p296_p9) }
  0x32   :  { %v207_v47 = vld [vmem:[#allocation7 + $0x1] sm:$0x1] (!%p296_p9)  ;;  %v211_v49 = vld [vmem:[#allocation7 + $0x2] sm:$0x1] (!%p296_p9)  ;;  %vm516_vm7 = vmor (!%p296_p9), %vm180_vm3, %vm184_vm6 }
  0x33   :  { %v187_v54 = vsel (!%p296_p9), %vm516_vm7, %v186_v42, 0.0  ;;  %v190_v55 = vsel (!%p296_p9), %vm516_vm7, %v189_v45, 0.0  ;;  %v193_v56 = vsel (!%p296_p9), %vm516_vm7, %v192_v48, 0.0  ;;  %v194_v57 = vsel (!%p296_p9), %vm516_vm7, %v171_v36, inf  ;;  %v220_v63 = vld [vmem:[#allocation7 + $0x4] sm:$0x1] (!%p296_p9) }
  0x34   :  { %v230_v53 = vld [vmem:[#allocation8] sm:$0x1] (!%p296_p9)  ;;  %v233_v58 = vld [vmem:[#allocation8 + $0x1] sm:$0x1] (!%p296_p9)  ;;  %v199_v59 = vmul.f32 (!%p296_p9), %v187_v54, %v187_v54  ;;  %v209_v60 = vadd.f32 (!%p296_p9), %v207_v47, %v190_v55  ;;  %v213_v61 = vadd.f32 (!%p296_p9), %v211_v49, %v193_v56  ;;  %v216_v62 = vmul.f32 (!%p296_p9), %v193_v56, %v190_v55  ;;  %v225_v0 = vld [vmem:[#allocation7 + $0x5] sm:$0x1] (!%p296_p9) }
  0x35   :  { %v236_v1 = vld [vmem:[#allocation10] sm:$0x1] (!%p296_p9)  ;;  %v221_v2 = vmul.f32 (!%p296_p9), %v190_v55, %v190_v55  ;;  %v226_v3 = vmul.f32 (!%p296_p9), %v193_v56, %v193_v56  ;;  %v231_v4 = vmin.f32 (!%p296_p9), %v230_v53, %v194_v57  ;;  %v196_v5 = vsel (!%p296_p9), %vm516_vm7, %v172_v37, inf  ;;  %v239_v6 = vld [vmem:[#allocation10 + $0x1] sm:$0x1] (!%p296_p9) }
  0x36   :  { %v201_v7 = vadd.f32 %v199_v59, %v198_v46  ;;  %210 = vst.msk [vmem:[#allocation7 + $0x1] sm:$0x1] %vm521_vm8, %v209_v60  ;;  %214 = vst.msk [vmem:[#allocation7 + $0x2] sm:$0x1] %vm521_vm8, %v213_v61  ;;  %v218_v8 = vadd.f32 %v216_v62, %v215_v52  ;;  %v234_v9 = vmin.f32 %v233_v58, %v196_v5  ;;  %v195_v10 = vsel %vm516_vm7, %v171_v36, -inf }
  0x37   :  { %v223_v11 = vadd.f32 %v221_v2, %v220_v63  ;;  %v228_v12 = vadd.f32 %v226_v3, %v225_v0  ;;  %232 = vst.msk [vmem:[#allocation8] sm:$0x1] %vm521_vm8, %v231_v4  ;;  %v237_v13 = vmax.f32 %v236_v1, %v195_v10  ;;  %v197_v14 = vsel %vm516_vm7, %v172_v37, -inf }
  0x38   :  { %206 = vst.msk [vmem:[#allocation7] sm:$0x1] %vm521_vm8, %v201_v7  ;;  %219 = vst.msk [vmem:[#allocation7 + $0x3] sm:$0x1] %vm521_vm8, %v218_v8  ;;  %v240_v15 = vmax.f32 %v239_v6, %v197_v14 }
  0x39   :  { %235 = vst.msk [vmem:[#allocation8 + $0x1] sm:$0x1] %vm521_vm8, %v234_v9  ;;  %224 = vst.msk [vmem:[#allocation7 + $0x4] sm:$0x1] %vm521_vm8, %v223_v11 }
  0x3a   :  { %229 = vst.msk [vmem:[#allocation7 + $0x5] sm:$0x1] %vm521_vm8, %v228_v12  ;;  %238 = vst.msk [vmem:[#allocation10] sm:$0x1] %vm521_vm8, %v237_v13 }
  0x3b   :  { %241 = vst.msk [vmem:[#allocation10 + $0x1] sm:$0x1] %vm521_vm8, %v240_v15 }
  0x3c PF:  { %s406_s2 = smov [#allocation8]   ;;  %s407_s22 = smov [#allocation7]  }
  0x3d   :  { %s258_s3 = sshll.u32 %s406_s2, 4  ;;  %s248_s23 = sshll.u32 %s407_s22, 4  ;;  %s259_s3 = int_to_ptr.vmem [resolvable:$true] %s258_s3  ;;  %s249_s23 = int_to_ptr.vmem [resolvable:$true] %s248_s23 }
  0x3e   :  { %s327_s24 = scalar_lea.vmem %s259_s3, 32  ;;  %p332_p11 = scmp.lt.s32.totalorder %s259_s3, %s259_s3 }
  0x3f   :  { %p328_p10 = scmp.ne.s32.totalorder %s259_s3, %s327_s24  ;;  %p333_p12 = scmp.lt.s32.totalorder %s327_s24, %s327_s24 }
  0x41   :  { %p334_p13 = por %p333_p12, %p332_p11 }
  0x43   :  { %p335_p0 = pnand %p334_p13, %p328_p10 }
  0x45   :  { %338 = shalt.err (!%p335_p0)
}
  0x46   :  { %s339_s27 = scalar_lea.hbm %s600_s5, 32 }
  0x47   :  { %p340_p1 = scmp.ne.s32.totalorder %s600_s5, %s339_s27  ;;  %p343_p2 = scmp.lt.u32.totalorder %s339_s27, %s600_s5 }
  0x49   :  { %p345_p3 = pnand %p343_p2, %p340_p1 }
  0x4b   :  { %348 = shalt.err (!%p345_p3)
}
  0x4c   :  { %261 = dma.vmem_to_hbm [thread:$0]  %s259_s3, 32, %s600_s5, [#allocation9]  }
  0x4d   :  { %s349_s1 = scalar_lea.vmem %s249_s23, 96  ;;  %p354_p5 = scmp.lt.s32.totalorder %s249_s23, %s249_s23 }
  0x4e   :  { %p350_p4 = scmp.ne.s32.totalorder %s249_s23, %s349_s1  ;;  %p355_p6 = scmp.lt.s32.totalorder %s349_s1, %s349_s1 }
  0x50   :  { %p356_p7 = por %p355_p6, %p354_p5 }
  0x52   :  { %p357_p8 = pnand %p356_p7, %p350_p4 }
  0x54   :  { %360 = shalt.err (!%p357_p8)
}
  0x55   :  { %s361_s12 = scalar_lea.hbm %s599_s4, 96 }
  0x56   :  { %p362_p9 = scmp.ne.s32.totalorder %s599_s4, %s361_s12  ;;  %p365_p10 = scmp.lt.u32.totalorder %s361_s12, %s599_s4 }
  0x58   :  { %p367_p11 = pnand %p365_p10, %p362_p9 }
  0x5a   :  { %370 = shalt.err (!%p367_p11)
}
  0x5b   :  { %251 = dma.vmem_to_hbm [thread:$0]  %s249_s23, 96, %s599_s4, [#allocation3]  }
  0x5c   :  { %s408_s17 = smov [#allocation10]  }
  0x5d   :  { %s268_s18 = sshll.u32 %s408_s17, 4  ;;  %s269_s18 = int_to_ptr.vmem [resolvable:$true] %s268_s18 }
  0x5e   :  { %s371_s19 = scalar_lea.vmem %s269_s18, 32  ;;  %p376_p13 = scmp.lt.s32.totalorder %s269_s18, %s269_s18 }
  0x5f   :  { %p372_p12 = scmp.ne.s32.totalorder %s269_s18, %s371_s19  ;;  %p377_p0 = scmp.lt.s32.totalorder %s371_s19, %s371_s19 }
  0x61   :  { %p378_p1 = por %p377_p0, %p376_p13 }
  0x63   :  { %p379_p2 = pnand %p378_p1, %p372_p12 }
  0x65   :  { %382 = shalt.err (!%p379_p2)
}
  0x66   :  { %s383_s2 = scalar_lea.hbm %s601_s6, 32 }
  0x67   :  { %p384_p3 = scmp.ne.s32.totalorder %s601_s6, %s383_s2  ;;  %p387_p4 = scmp.lt.u32.totalorder %s383_s2, %s601_s6 }
  0x69   :  { %p389_p5 = pnand %p387_p4, %p384_p3 }
  0x6b   :  { %392 = shalt.err (!%p389_p5)
}
  0x6c   :  { %271 = dma.vmem_to_hbm [thread:$0]  %s269_s18, 32, %s601_s6, [#allocation9]  }
  0x6d   :  { %397 = dma.done.wait [#allocation3], 96  }
  0x6e   :  { %398 = vsyncadd [#allocation3], 4294967200 }
  0x6f   :  { %399 = dma.done.wait [#allocation9], 64  }
  0x70   :  { %400 = vsyncadd [#allocation9], 4294967232 }
  0x71   :  { %281 = vsyncpa [#allocation3], 1 }
  0x72   :  { %282 = vsyncpa [#allocation9], 1 }
  0x73   :  { %283 = vsyncpa [#allocation4], 1 }
  0x74   :  { %284 = vsyncpa [#allocation5], 1 }

</bundles_post_ra>
